<compile_context>
chip_gen: v6e
topology: v6e:2x2x1
jax: 0.10.0
libtpu: 0.0.40
codegen_flags: <defaults>
</compile_context>

<pallas_src>
import math
import functools

import jax
import jax.numpy as jnp
from jax.experimental import pallas as pl
from jax.experimental.pallas import tpu as pltpu

_INV_SQRT2 = 1.0 / math.sqrt(2.0)


def _mlp_kernel(x_ref, w1_ref, b1_ref, w2_ref, b2_ref, o_ref, acc_ref):
    # x_ref:  (tm, Ep)   token tile (resident across the j axis: index map is (i, 0))
    # w1_ref: (Ep, th)   column slice of first linear weight
    # b1_ref: (1, th)    matching slice of first bias (f32)
    # w2_ref: (th, Ep)   row slice of second linear weight
    # b2_ref: (1, Ep)    second bias (f32), added only in the finalize branch
    # o_ref:  (tm, Ep)   output tile (written only at the last hidden step)
    # acc_ref:(tm, Ep)   f32 accumulator in VMEM scratch
    j = pl.program_id(1)

    @pl.when(j == 0)
    def _():
        acc_ref[...] = jnp.zeros_like(acc_ref)

    # First matmul on the MXU with f32 accumulation.
    h = jnp.dot(x_ref[...], w1_ref[...], preferred_element_type=jnp.float32)
    h = h + b1_ref[...]
    # Exact (erf-based) GELU in f32 -- matches torch.nn.GELU(approximate='none').
    h = 0.5 * h * (1.0 + jax.lax.erf(h * _INV_SQRT2))

    # Second matmul: accumulate the partial product over hidden-dim tiles.
    acc_ref[...] += jnp.dot(
        h.astype(w2_ref.dtype), w2_ref[...], preferred_element_type=jnp.float32
    )

    @pl.when(j == pl.num_programs(1) - 1)
    def _():
        o_ref[...] = (acc_ref[...] + b2_ref[...]).astype(o_ref.dtype)


def _round_up(n, m):
    return ((n + m - 1) // m) * m


@functools.partial(jax.jit, static_argnames=("tm", "th", "use_bf16"))
def mlp_pallas(x, w1, b1, w2, b2, *, tm=256, th=512, use_bf16=False):
    """x: (B, T, E). w1: (E, 4E), b1: (1, 4E), w2: (4E, E), b2: (1, E)."""
    B, T, E = x.shape
    H = w1.shape[1]
    M = B * T
    out_dtype = x.dtype

    # Lane-dense feature dims (multiples of 128); zero padding preserves semantics
    # (extra hidden units see bias 0 -> GELU(0)=0 -> contribute 0; extra output
    # columns are sliced away at the end).
    Ep = _round_up(E, 128)
    Hp = _round_up(H, 128)

    # Token tile: multiple of 8 sublanes, capped by the token count.
    tm = _round_up(min(tm, _round_up(M, 8)), 8)
    # Hidden tile: multiple of 128 lanes, capped by the padded hidden dim;
    # make the padded hidden dim an exact multiple of th so the grid divides evenly.
    th = _round_up(min(th, Hp), 128)
    Hp = _round_up(Hp, th)

    x2 = jnp.pad(x.reshape(M, E), ((0, 0), (0, Ep - E)))
    w1p = jnp.pad(w1, ((0, Ep - E), (0, Hp - H)))
    b1p = jnp.pad(b1.reshape(1, H), ((0, 0), (0, Hp - H))).astype(jnp.float32)
    w2p = jnp.pad(w2, ((0, Hp - H), (0, Ep - E)))
    b2p = jnp.pad(b2.reshape(1, E), ((0, 0), (0, Ep - E))).astype(jnp.float32)

    mm_dtype = jnp.bfloat16 if use_bf16 else x.dtype
    x2 = x2.astype(mm_dtype)
    w1p = w1p.astype(mm_dtype)
    w2p = w2p.astype(mm_dtype)

    grid = (pl.cdiv(M, tm), Hp // th)

    # VMEM budget estimate: double-buffered x/w1/w2/b tiles + output tile + f32
    # accumulator + GELU intermediate. Clamp so we never request more than ~110 MiB
    # (and at least the default scoped limit).
    mm_bytes = jnp.dtype(mm_dtype).itemsize
    vmem_est = (
        2 * (tm * Ep + Ep * th + th * Ep) * mm_bytes  # pipelined input tiles
        + 2 * tm * Ep * jnp.dtype(out_dtype).itemsize  # output tile
        + tm * Ep * 4                                  # accumulator scratch
        + tm * th * 4                                  # GELU intermediate
        + 2 * (th + Ep) * 4                            # biases
    )
    vmem_limit = int(min(max(2 * vmem_est, 32 * 1024 * 1024), 110 * 1024 * 1024))

    out = pl.pallas_call(
        _mlp_kernel,
        out_shape=jax.ShapeDtypeStruct((M, Ep), out_dtype),
        grid_spec=pltpu.PrefetchScalarGridSpec(
            num_scalar_prefetch=0,
            grid=grid,
            in_specs=[
                pl.BlockSpec((tm, Ep), lambda i, j: (i, 0)),   # x tile (resident over j)
                pl.BlockSpec((Ep, th), lambda i, j: (0, j)),   # w1 column slice
                pl.BlockSpec((1, th), lambda i, j: (0, j)),    # b1 slice
                pl.BlockSpec((th, Ep), lambda i, j: (j, 0)),   # w2 row slice
                pl.BlockSpec((1, Ep), lambda i, j: (0, 0)),    # b2 (resident)
            ],
            out_specs=pl.BlockSpec((tm, Ep), lambda i, j: (i, 0)),
            scratch_shapes=[pltpu.VMEM((tm, Ep), jnp.float32)],
        ),
        compiler_params=pltpu.CompilerParams(
            dimension_semantics=("parallel", "arbitrary"),
            vmem_limit_bytes=vmem_limit,
        ),
    )(x2, w1p, b1p, w2p, b2p)

    return out[:, :E].reshape(B, T, E)


def _ref_mlp(x, w1, b1, w2, b2):
    h = x @ w1 + b1[0]
    h = 0.5 * h * (1.0 + jax.lax.erf(h * _INV_SQRT2))
    return h @ w2 + b2[0]


if __name__ == "__main__":
    # small shapes consistent with the module: batch=2, seq=8, embdg_dim=32
    B, T, E = 2, 8, 32
    H = 4 * E

    key = jax.random.PRNGKey(0)
    kx, k1, k2, k3, k4 = jax.random.split(key, 5)

    x = jax.random.normal(kx, (B, T, E), dtype=jnp.float32)

    # deterministic params (uniform like torch.nn.Linear's default init bounds)
    lim1 = 1.0 / math.sqrt(E)
    lim2 = 1.0 / math.sqrt(H)
    w1 = jax.random.uniform(k1, (E, H), jnp.float32, -lim1, lim1)
    b1 = jax.random.uniform(k2, (1, H), jnp.float32, -lim1, lim1)
    w2 = jax.random.uniform(k3, (H, E), jnp.float32, -lim2, lim2)
    b2 = jax.random.uniform(k4, (1, E), jnp.float32, -lim2, lim2)

    ref = _ref_mlp(x.reshape(B * T, E), w1, b1, w2, b2).reshape(B, T, E)

    # Torch-exact path: f32 matmuls + erf GELU.
    out = mlp_pallas(x, w1, b1, w2, b2, use_bf16=False)
    jax.block_until_ready(out)
    assert out.shape == (B, T, E)
    assert jnp.allclose(out, ref, atol=1e-5, rtol=1e-5), "f32 mismatch vs reference"

    # bf16-MXU fast path (f32 accumulation) -- numerics change slightly, loose check.
    out_bf16 = mlp_pallas(x, w1, b1, w2, b2, use_bf16=True)
    jax.block_until_ready(out_bf16)
    assert jnp.allclose(out_bf16, ref, atol=5e-2, rtol=5e-2), "bf16 mismatch vs reference"

    print("KERNEL_OK")
</pallas_src>

<mosaic_0001>
module attributes {stable_mosaic.version = 11 : i64} {
  func.func @_mlp_kernel(%arg0: i32, %arg1: i32, %arg2: memref<16x128xf32, #tpu.memory_space<vmem>>, %arg3: memref<128x128xf32, #tpu.memory_space<vmem>>, %arg4: memref<1x128xf32, #tpu.memory_space<vmem>>, %arg5: memref<128x128xf32, #tpu.memory_space<vmem>>, %arg6: memref<1x128xf32, #tpu.memory_space<vmem>>, %arg7: memref<16x128xf32, #tpu.memory_space<vmem>>, %arg8: memref<16x128xf32, #tpu.memory_space<vmem>>) attributes {dimension_semantics = [#tpu.dimension_semantics<parallel>, #tpu.dimension_semantics<arbitrary>], iteration_bounds = array<i64: 1, 1>, scalar_prefetch = 0 : i64, scratch_operands = 1 : i64, tpu.core_type = #tpu.core_type<tc>, window_params = [{transform_indices = @transform_0, window_bounds = array<i64: 16, 128>}, {transform_indices = @transform_1, window_bounds = array<i64: 128, 128>}, {transform_indices = @transform_2, window_bounds = array<i64: 1, 128>}, {transform_indices = @transform_3, window_bounds = array<i64: 128, 128>}, {pipeline_mode = #tpu.pipeline_mode<synchronous>, transform_indices = @transform_4, window_bounds = array<i64: 1, 128>}, {transform_indices = @transform_5, window_bounds = array<i64: 16, 128>}]} {
    %c0_i32 = arith.constant 0 : i32
    %0 = arith.cmpi eq, %arg1, %c0_i32 : i32
    %1 = arith.extui %0 : i1 to i32
    %c0_i32_0 = arith.constant 0 : i32
    %2 = arith.cmpi ne, %1, %c0_i32_0 : i32
    scf.if %2 {
      %cst_18 = arith.constant 0.000000e+00 : f32
      %25 = vector.broadcast %cst_18 : f32 to vector<16x128xf32>
      %c0_19 = arith.constant 0 : index
      %c0_20 = arith.constant 0 : index
      %26 = vector.load %arg8[%c0_19, %c0_20] : memref<16x128xf32, #tpu.memory_space<vmem>>, vector<16x128xf32>
      tpu.vector_store %arg8[%c0_19, %c0_20], %25 {strides = array<i32>} : memref<16x128xf32, #tpu.memory_space<vmem>>, vector<16x128xf32>,
    } else {
    }
    %c0 = arith.constant 0 : index
    %c0_1 = arith.constant 0 : index
    %3 = vector.load %arg2[%c0, %c0_1] : memref<16x128xf32, #tpu.memory_space<vmem>>, vector<16x128xf32>
    %c0_2 = arith.constant 0 : index
    %c0_3 = arith.constant 0 : index
    %4 = vector.load %arg3[%c0_2, %c0_3] : memref<128x128xf32, #tpu.memory_space<vmem>>, vector<128x128xf32>
    %cst = arith.constant dense<0.000000e+00> : vector<16x128xf32>
    %5 = tpu.matmul %3, %4, %cst {dimension_numbers = #tpu.dot_dimension_numbers<[1], [0], [0], [1], [0, 0, 1, 1], [], []>} : vector<16x128xf32>, vector<128x128xf32>, vector<16x128xf32> -> vector<16x128xf32>
    %c0_4 = arith.constant 0 : index
    %c0_5 = arith.constant 0 : index
    %6 = vector.load %arg4[%c0_4, %c0_5] : memref<1x128xf32, #tpu.memory_space<vmem>>, vector<1x128xf32>
    %7 = vector.broadcast %6 : vector<1x128xf32> to vector<16x128xf32>
    %8 = arith.addf %5, %7 : vector<16x128xf32>
    %cst_6 = arith.constant 5.000000e-01 : f32
    %9 = vector.broadcast %cst_6 : f32 to vector<16x128xf32>
    %10 = arith.mulf %9, %8 : vector<16x128xf32>
    %cst_7 = arith.constant 0.707106769 : f32
    %11 = vector.broadcast %cst_7 : f32 to vector<16x128xf32>
    %12 = arith.mulf %8, %11 : vector<16x128xf32>
    %13 = math.erf %12 : vector<16x128xf32>
    %cst_8 = arith.constant 1.000000e+00 : f32
    %14 = vector.broadcast %cst_8 : f32 to vector<16x128xf32>
    %15 = arith.addf %14, %13 : vector<16x128xf32>
    %16 = arith.mulf %10, %15 : vector<16x128xf32>
    %c0_9 = arith.constant 0 : index
    %c0_10 = arith.constant 0 : index
    %17 = vector.load %arg8[%c0_9, %c0_10] : memref<16x128xf32, #tpu.memory_space<vmem>>, vector<16x128xf32>
    %c0_11 = arith.constant 0 : index
    %c0_12 = arith.constant 0 : index
    %18 = vector.load %arg5[%c0_11, %c0_12] : memref<128x128xf32, #tpu.memory_space<vmem>>, vector<128x128xf32>
    %cst_13 = arith.constant dense<0.000000e+00> : vector<16x128xf32>
    %19 = tpu.matmul %16, %18, %cst_13 {dimension_numbers = #tpu.dot_dimension_numbers<[1], [0], [0], [1], [0, 0, 1, 1], [], []>} : vector<16x128xf32>, vector<128x128xf32>, vector<16x128xf32> -> vector<16x128xf32>
    %20 = arith.addf %17, %19 : vector<16x128xf32>
    %c0_14 = arith.constant 0 : index
    %c0_15 = arith.constant 0 : index
    %21 = vector.load %arg8[%c0_14, %c0_15] : memref<16x128xf32, #tpu.memory_space<vmem>>, vector<16x128xf32>
    tpu.vector_store %arg8[%c0_14, %c0_15], %20 {strides = array<i32>} : memref<16x128xf32, #tpu.memory_space<vmem>>, vector<16x128xf32>,
    %c0_i32_16 = arith.constant 0 : i32
    %22 = arith.cmpi eq, %arg1, %c0_i32_16 : i32
    %23 = arith.extui %22 : i1 to i32
    %c0_i32_17 = arith.constant 0 : i32
    %24 = arith.cmpi ne, %23, %c0_i32_17 : i32
    scf.if %24 {
      %c0_18 = arith.constant 0 : index
      %c0_19 = arith.constant 0 : index
      %25 = vector.load %arg8[%c0_18, %c0_19] : memref<16x128xf32, #tpu.memory_space<vmem>>, vector<16x128xf32>
      %c0_20 = arith.constant 0 : index
      %c0_21 = arith.constant 0 : index
      %26 = vector.load %arg6[%c0_20, %c0_21] : memref<1x128xf32, #tpu.memory_space<vmem>>, vector<1x128xf32>
      %27 = vector.broadcast %26 : vector<1x128xf32> to vector<16x128xf32>
      %28 = arith.addf %25, %27 : vector<16x128xf32>
      %c0_22 = arith.constant 0 : index
      %c0_23 = arith.constant 0 : index
      %29 = vector.load %arg7[%c0_22, %c0_23] : memref<16x128xf32, #tpu.memory_space<vmem>>, vector<16x128xf32>
      tpu.vector_store %arg7[%c0_22, %c0_23], %28 {strides = array<i32>} : memref<16x128xf32, #tpu.memory_space<vmem>>, vector<16x128xf32>,
    } else {
    }
    return
  }
  func.func @transform_0(%arg0: i32, %arg1: i32) -> (i32, i32) {
    %c0_i32 = arith.constant 0 : i32
    %c0_i32_0 = arith.constant 0 : i32
    return %arg0, %c0_i32 : i32, i32
  }
  func.func @transform_1(%arg0: i32, %arg1: i32) -> (i32, i32) {
    %c0_i32 = arith.constant 0 : i32
    %c0_i32_0 = arith.constant 0 : i32
    return %c0_i32, %arg1 : i32, i32
  }
  func.func @transform_2(%arg0: i32, %arg1: i32) -> (i32, i32) {
    %c0_i32 = arith.constant 0 : i32
    %c0_i32_0 = arith.constant 0 : i32
    return %c0_i32, %arg1 : i32, i32
  }
  func.func @transform_3(%arg0: i32, %arg1: i32) -> (i32, i32) {
    %c0_i32 = arith.constant 0 : i32
    %c0_i32_0 = arith.constant 0 : i32
    return %arg1, %c0_i32 : i32, i32
  }
  func.func @transform_4(%arg0: i32, %arg1: i32) -> (i32, i32) {
    %c0_i32 = arith.constant 0 : i32
    %c0_i32_0 = arith.constant 0 : i32
    %c0_i32_1 = arith.constant 0 : i32
    return %c0_i32, %c0_i32_0 : i32, i32
  }
  func.func @transform_5(%arg0: i32, %arg1: i32) -> (i32, i32) {
    %c0_i32 = arith.constant 0 : i32
    %c0_i32_0 = arith.constant 0 : i32
    return %arg0, %c0_i32 : i32, i32
  }
}

</mosaic_0001>

<bundles_post_ra>
// kernel: mlp_pallas.1
= control target key start
LH: loop header
LB: loop body
LE: loop exit
PB: predicated region body
PF: predicated region fallthrough
CT: control target
= control target key end

     0   :  { %s509_s1 = inlined_call_operand.vmem [shape: f32[128,128], index: 1, kind: input, shape index: {}]   ;;  %s510_s0 = inlined_call_operand.vmem [shape: f32[16,128], index: 0, kind: input, shape index: {}]   ;;  %s511_s3 = inlined_call_operand.vmem [shape: f32[128,128], index: 3, kind: input, shape index: {}]   ;;  %s512_s2 = inlined_call_operand.vmem [shape: f32[1,128], index: 2, kind: input, shape index: {}]   ;;  %s513_s4 = inlined_call_operand.vmem [shape: f32[1,128], index: 4, kind: input, shape index: {}]   ;;  %s514_s5 = inlined_call_operand.vmem [shape: f32[16,128], index: 5, kind: output, shape index: {}]  }
   0x1   :  { %v43_v0 = vld [vmem:[%s509_s1 + $0x78] sm:$0xff]  ;;  %v42_v1 = vld [vmem:[%s509_s1 + $0x70] sm:$0xff]  ;;  %v41_v2 = vld [vmem:[%s509_s1 + $0x68] sm:$0xff] }
   0x2   :  { %291 = vmatprep.subr.mxu0 %v43_v0  ;;  %v40_v3 = vld [vmem:[%s509_s1 + $0x60] sm:$0xff]  ;;  %v39_v5 = vld [vmem:[%s509_s1 + $0x58] sm:$0xff]  ;;  %v152_v7 = vld [vmem:[%s511_s3 + $0x70] sm:$0xff] }
   0x3   :  { %292 = vmatpush3.msra.mxu0 %v43_v0  ;;  %v26_v4 = vld [vmem:[%s510_s0] sm:$0xff]  ;;  %v153_v6 = vld [vmem:[%s511_s3 + $0x78] sm:$0xff]  ;;  %v38_v8 = vld [vmem:[%s509_s1 + $0x50] sm:$0xff] }
   0x4   :  { %293 = vmatprep.subr.mxu0 %v42_v1  ;;  %323 = vmatprep.mubr.f32.mxu0 %v26_v4  ;;  %v151_v9 = vld [vmem:[%s511_s3 + $0x68] sm:$0xff]  ;;  %v36_v11 = vld [vmem:[%s509_s1 + $0x40] sm:$0xff]  ;;  %v35_v12 = vld [vmem:[%s509_s1 + $0x38] sm:$0xff] }
   0x5   :  { %294 = vmatpush3.msra.mxu0 %v42_v1  ;;  %326 = vmatprep.subr.mxu1 %v153_v6  ;;  %v37_v10 = vld [vmem:[%s509_s1 + $0x48] sm:$0xff]  ;;  %v34_v13 = vld [vmem:[%s509_s1 + $0x30] sm:$0xff]  ;;  %v32_v15 = vld [vmem:[%s509_s1 + $0x20] sm:$0xff] }
   0x6   :  { %295 = vmatprep.subr.mxu0 %v41_v2  ;;  %327 = vmatpush3.msra.mxu1 %v153_v6  ;;  %v33_v14 = vld [vmem:[%s509_s1 + $0x28] sm:$0xff]  ;;  %v31_v16 = vld [vmem:[%s509_s1 + $0x18] sm:$0xff]  ;;  %v30_v17 = vld [vmem:[%s509_s1 + $0x10] sm:$0xff] }
   0x7   :  { %296 = vmatpush3.msra.mxu0 %v41_v2  ;;  %328 = vmatprep.subr.mxu1 %v152_v7  ;;  %v29_v18 = vld [vmem:[%s509_s1 + $0x8] sm:$0xff]  ;;  %v28_v19 = vld [vmem:[%s509_s1] sm:$0xff]  ;;  %v149_v22 = vld [vmem:[%s511_s3 + $0x58] sm:$0xff] }
   0x8   :  { %297 = vmatprep.subr.mxu0 %v40_v3  ;;  %329 = vmatpush3.msra.mxu1 %v152_v7  ;;  %v27_v20 = vld [vmem:[%s510_s0 + $0x8] sm:$0xff]  ;;  %v150_v21 = vld [vmem:[%s511_s3 + $0x60] sm:$0xff]  ;;  %v148_v23 = vld [vmem:[%s511_s3 + $0x50] sm:$0xff] }
   0x9   :  { %298 = vmatpush3.msra.mxu0 %v40_v3  ;;  %330 = vmatprep.subr.mxu1 %v151_v9  ;;  %v147_v24 = vld [vmem:[%s511_s3 + $0x48] sm:$0xff]  ;;  %v146_v25 = vld [vmem:[%s511_s3 + $0x40] sm:$0xff]  ;;  %v145_v26 = vld [vmem:[%s511_s3 + $0x38] sm:$0xff] }
   0xa   :  { %299 = vmatprep.subr.mxu0 %v39_v5  ;;  %331 = vmatpush3.msra.mxu1 %v151_v9  ;;  %v144_v27 = vld [vmem:[%s511_s3 + $0x30] sm:$0xff]  ;;  %v143_v28 = vld [vmem:[%s511_s3 + $0x28] sm:$0xff]  ;;  %v142_v29 = vld [vmem:[%s511_s3 + $0x20] sm:$0xff] }
   0xb   :  { %300 = vmatpush3.msra.mxu0 %v39_v5  ;;  %332 = vmatprep.subr.mxu1 %v150_v21  ;;  %v141_v30 = vld [vmem:[%s511_s3 + $0x18] sm:$0xff]  ;;  %v140_v31 = vld [vmem:[%s511_s3 + $0x10] sm:$0xff]  ;;  %v139_v32 = vld [vmem:[%s511_s3 + $0x8] sm:$0xff] }
   0xc   :  { %301 = vmatprep.subr.mxu0 %v38_v8  ;;  %333 = vmatpush3.msra.mxu1 %v150_v21  ;;  %v138_v33 = vld [vmem:[%s511_s3] sm:$0xff] }
   0xd   :  { %302 = vmatpush3.msra.mxu0 %v38_v8  ;;  %334 = vmatprep.subr.mxu1 %v149_v22  ;;  %v253_v34 = vld [vmem:[%s512_s2] ss:$0 sm:$0xff] }
   0xe   :  { %303 = vmatprep.subr.mxu0 %v37_v10  ;;  %335 = vmatpush3.msra.mxu1 %v149_v22  ;;  %v254_v49 = vld [vmem:[%s513_s4] ss:$0 sm:$0xff] }
   0xf   :  { %304 = vmatpush3.msra.mxu0 %v37_v10  ;;  %336 = vmatprep.subr.mxu1 %v148_v23 }
  0x10   :  { %305 = vmatprep.subr.mxu0 %v36_v11  ;;  %337 = vmatpush3.msra.mxu1 %v148_v23 }
  0x11   :  { %306 = vmatpush3.msra.mxu0 %v36_v11  ;;  %338 = vmatprep.subr.mxu1 %v147_v24 }
  0x12   :  { %307 = vmatprep.subr.mxu0 %v35_v12  ;;  %339 = vmatpush3.msra.mxu1 %v147_v24 }
  0x13   :  { %308 = vmatpush3.msra.mxu0 %v35_v12  ;;  %340 = vmatprep.subr.mxu1 %v146_v25 }
  0x14   :  { %309 = vmatprep.subr.mxu0 %v34_v13  ;;  %341 = vmatpush3.msra.mxu1 %v146_v25 }
  0x15   :  { %310 = vmatpush3.msra.mxu0 %v34_v13  ;;  %342 = vmatprep.subr.mxu1 %v145_v26 }
  0x16   :  { %311 = vmatprep.subr.mxu0 %v33_v14  ;;  %343 = vmatpush3.msra.mxu1 %v145_v26 }
  0x17   :  { %312 = vmatpush3.msra.mxu0 %v33_v14  ;;  %344 = vmatprep.subr.mxu1 %v144_v27 }
  0x18   :  { %313 = vmatprep.subr.mxu0 %v32_v15  ;;  %345 = vmatpush3.msra.mxu1 %v144_v27 }
  0x19   :  { %314 = vmatpush3.msra.mxu0 %v32_v15  ;;  %346 = vmatprep.subr.mxu1 %v143_v28 }
  0x1a   :  { %315 = vmatprep.subr.mxu0 %v31_v16  ;;  %347 = vmatpush3.msra.mxu1 %v143_v28 }
  0x1b   :  { %316 = vmatpush3.msra.mxu0 %v31_v16  ;;  %348 = vmatprep.subr.mxu1 %v142_v29 }
  0x1c   :  { %317 = vmatprep.subr.mxu0 %v30_v17  ;;  %349 = vmatpush3.msra.mxu1 %v142_v29 }
  0x1d   :  { %318 = vmatpush3.msra.mxu0 %v30_v17  ;;  %350 = vmatprep.subr.mxu1 %v141_v30 }
  0x1e   :  { %319 = vmatprep.subr.mxu0 %v29_v18  ;;  %351 = vmatpush3.msra.mxu1 %v141_v30 }
  0x1f   :  { %320 = vmatpush3.msra.mxu0 %v29_v18  ;;  %352 = vmatprep.subr.mxu1 %v140_v31 }
  0x20   :  { %321 = vmatprep.subr.mxu0 %v28_v19  ;;  %353 = vmatpush3.msra.mxu1 %v140_v31 }
  0x21   :  { %322 = vmatpush3.msra.mxu0 %v28_v19  ;;  %354 = vmatprep.subr.mxu1 %v139_v32 }
  0x22   :  { %324 = vmatmul.mubr.f32.vlgmr.msra.gmra.mxu0 %v27_v20  ;;  %355 = vmatpush3.msra.mxu1 %v139_v32 }
  0x23   :  { %356 = vmatprep.subr.mxu1 %v138_v33 }
  0x24   :  { %357 = vmatpush3.msra.mxu1 %v138_v33 }
  0xe2   :  { %v325_v35 = vpop.f32.mrf.mxu0 }
  0xe3   :  { %v123_v36 = vadd.f32 %v325_v35, %v253_v34 }
  0xe4   :  { %v117_v37 = vpop.f32.mrf.mxu0 }
  0xe5   :  { %v129_v38 = vmul.f32 0.70710677, %v123_v36  ;;  %v118_v39 = vadd.f32 %v253_v34, %v117_v37  ;;  %v127_v46 = vmul.f32 0.5, %v123_v36 }
  0xe7   :  { %361 = verf.f32 %v129_v38  ;;  %v128_v40 = vmul.f32 0.70710677, %v118_v39  ;;  %v126_v44 = vmul.f32 0.5, %v118_v39 }
  0xe9   :  { %363 = verf.f32 %v128_v40 }
  0xf4   :  { %v362_v41 = vpop.eup %361 }
  0xf5   :  { %v133_v43 = vadd.f32 1.0, %v362_v41 }
  0xf6   :  { %v364_v42 = vpop.eup %363 }
  0xf7   :  { %v132_v45 = vadd.f32 1.0, %v364_v42  ;;  %v135_v48 = vmul.f32 %v133_v43, %v127_v46 }
  0xf9   :  { %v134_v47 = vmul.f32 %v132_v45, %v126_v44 }
  0xfb   :  { %358 = vmatprep.mubr.f32.mxu1 %v134_v47 }
  0xfc   :  { %359 = vmatmul.mubr.f32.vlgmr.msra.gmra.mxu1 %v135_v48 }
 0x1bc   :  { %v360_v50 = vpop.f32.mrf.mxu1 }
 0x1bd   :  { %v246_v51 = vadd.f32 %v360_v50, %v254_v49 }
 0x1be   :  { %v220_v52 = vpop.f32.mrf.mxu1 }
 0x1bf   :  { %248 = vst [vmem:[%s514_s5 + $0x8] sm:$0xff] %v246_v51  ;;  %v245_v53 = vadd.f32 %v254_v49, %v220_v52 }
 0x1c1   :  { %247 = vst [vmem:[%s514_s5] sm:$0xff] %v245_v53 }

</bundles_post_ra>
